<compile_context>
chip_gen: v7x
topology: tpu7x:2x2x1
jax: 0.10.0
libtpu: 0.0.40
codegen_flags: <defaults>
</compile_context>

<pallas_src>
import functools

import jax
import jax.numpy as jnp
from jax.experimental import pallas as pl
from jax.experimental.pallas import tpu as pltpu

LANES = 128      # vreg lane width
SUBLANES = 8     # f32 sublane count


def _round_up(x, m):
    return ((x + m - 1) // m) * m


# ----------------------------------------------------------------------------
# Pallas kernel: full BetaVAE forward (encoder + reparameterize + decoder)
# ----------------------------------------------------------------------------
def _betavae_kernel(training, lp, x_ref, w1_ref, b1_ref, wml_ref, bml_ref, *refs):
    if training:
        (eps_ref, wd1_ref, bd1_ref, wd2_ref, bd2_ref,
         recon_ref, stats_ref) = refs
    else:
        (wd1_ref, bd1_ref, wd2_ref, bd2_ref,
         recon_ref, stats_ref) = refs

    # ---- Encoder (bf16 matmuls, f32 accumulation). x cast in-kernel (hides under DMA). ----
    x = x_ref[...].astype(jnp.bfloat16)
    h = jnp.dot(x, w1_ref[...], preferred_element_type=jnp.float32)
    h = jnp.maximum(h + b1_ref[...], 0.0).astype(jnp.bfloat16)

    # Fused mu|logvar projection: one lane-dense [tb, 2*lp] matmul, 128-aligned slices.
    stats = jnp.dot(h, wml_ref[...], preferred_element_type=jnp.float32) + bml_ref[...]
    mu = stats[:, :lp]        # [tb, lp]  (lanes >= n_latents are exactly 0)
    logvar = stats[:, lp:]    # [tb, lp]

    # ---- Reparameterize (f32) ----
    if training:
        std = jnp.exp(0.5 * logvar)      # padded lanes: exp(0)=1, eps pad = 0 -> z pad = 0
        z = mu + std * eps_ref[...]
    else:
        z = mu

    # ---- Decoder ----
    hd = jnp.dot(z.astype(jnp.bfloat16), wd1_ref[...],
                 preferred_element_type=jnp.float32)
    hd = jnp.maximum(hd + bd1_ref[...], 0.0).astype(jnp.bfloat16)
    logits = jnp.dot(hd, wd2_ref[...], preferred_element_type=jnp.float32) + bd2_ref[...]

    # sigmoid(x) = 1 / (1 + exp(-x)); exp + approx reciprocal both live on the EUP slot.
    recon = pl.reciprocal(1.0 + jnp.exp(-logits), approx=True)
    recon_ref[...] = recon.astype(jnp.bfloat16)   # bf16 writeback: halves the dominant HBM stream
    stats_ref[...] = stats                        # single wide f32 store (mu | logvar)


# ----------------------------------------------------------------------------
# Parameter init & kernel-ready packing
# ----------------------------------------------------------------------------
def init_betavae_params(key, input_shape, n_latents=10, hidden=128):
    """Deterministic synthetic parameter init (not a checkpoint load)."""
    C, H, W = input_shape
    d_in = C * H * W
    ks = jax.random.split(key, 5)

    def lin(k, fan_in, fan_out):
        scale = 1.0 / jnp.sqrt(jnp.float32(fan_in))
        w = jax.random.uniform(k, (fan_in, fan_out), jnp.float32, -scale, scale)
        b = jnp.zeros((fan_out,), jnp.float32)
        return w, b

    w1, b1 = lin(ks[0], d_in, hidden)
    wmu, bmu = lin(ks[1], hidden, n_latents)
    wlv, blv = lin(ks[2], hidden, n_latents)
    wd1, bd1 = lin(ks[3], n_latents, hidden)
    wd2, bd2 = lin(ks[4], hidden, d_in)
    return {"w1": w1, "b1": b1, "wmu": wmu, "bmu": bmu, "wlv": wlv, "blv": blv,
            "wd1": wd1, "bd1": bd1, "wd2": wd2, "bd2": bd2}


def pack_params(params, n_latents):
    """One-time pad/fuse/cast of weights into the kernel-ready layout."""
    d_in, hidden = params["w1"].shape
    lp = _round_up(max(n_latents, 1), LANES)      # latent dim padded to 128 lanes

    # Fused mu|logvar weight: [hidden, 2*lp], each half 128-aligned, pad columns zero.
    wml = jnp.zeros((hidden, 2 * lp), jnp.float32)
    wml = wml.at[:, :n_latents].set(params["wmu"])
    wml = wml.at[:, lp:lp + n_latents].set(params["wlv"])
    bml = jnp.zeros((2 * lp,), jnp.float32)
    bml = bml.at[:n_latents].set(params["bmu"])
    bml = bml.at[lp:lp + n_latents].set(params["blv"])

    # Decoder first layer: pad contraction dim (latents) to 128 with zero rows.
    wd1 = jnp.zeros((lp, hidden), jnp.float32).at[:n_latents, :].set(params["wd1"])

    bf = jnp.bfloat16
    return {
        "lp": lp, "d_in": d_in, "hidden": hidden, "n_latents": n_latents,
        "w1": params["w1"].astype(bf), "b1": params["b1"].reshape(1, -1),
        "wml": wml.astype(bf), "bml": bml.reshape(1, -1),
        "wd1": wd1.astype(bf), "bd1": params["bd1"].reshape(1, -1),
        "wd2": params["wd2"].astype(bf), "bd2": params["bd2"].reshape(1, -1),
    }


# ----------------------------------------------------------------------------
# Generation-aware tiling / VMEM budgeting
# ----------------------------------------------------------------------------
def _vmem_capacity_bytes():
    try:
        return int(pltpu.get_tpu_info().vmem_capacity_bytes)
    except Exception:
        return 64 * 1024 * 1024   # conservative fallback (v7x per-TensorCore VMEM)


def _choose_batch_tile(B, d_in, lp, hidden, x_itemsize, training, vmem_budget):
    """Largest 8-aligned batch tile (<=512) that fits the VMEM budget; split the grid
    into >=2 steps when B is small so both v7x TensorCores get work."""
    if B <= SUBLANES:
        return B  # single block; second-to-last block dim == full array dim (allowed)

    # Resident weights+biases; conservatively assume default 2x buffering.
    w_bytes = 2 * (2 * (d_in * hidden + hidden * 2 * lp + lp * hidden + hidden * d_in)
                   + 4 * (2 * hidden + 2 * lp + d_in))
    # Double-buffered pipelined tiles per batch row: x in, bf16 recon out, f32 stats out, eps.
    pipe_row = 2 * (x_itemsize * d_in + 2 * d_in + 4 * 2 * lp
                    + (4 * lp if training else 0))
    # In-kernel temporaries per row (f32 logits + sigmoid, bf16 h/hd, f32 stats).
    tmp_row = 8 * d_in + 4 * hidden + 8 * lp
    per_row = pipe_row + tmp_row

    avail = max(vmem_budget - w_bytes, per_row * SUBLANES)
    tb_cap = int(min(512, (avail // per_row) // SUBLANES * SUBLANES))
    tb_cap = max(SUBLANES, tb_cap)
    tb_cap = min(tb_cap, (B // SUBLANES) * SUBLANES)   # keep block <= array (partial last block ok)

    if B <= 2 * tb_cap:
        # Aim for >= 2 grid steps -> both v7x TCs busy; harmless serial loop on v5e/v6e.
        tb = min(tb_cap, _round_up(-(-B // 2), SUBLANES))
    else:
        tb = tb_cap
    return max(SUBLANES, tb)


# ----------------------------------------------------------------------------
# Wrapper
# ----------------------------------------------------------------------------
def betavae_forward(packed, x_nchw, eps=None, *, training=False):
    """Runs the fused BetaVAE forward pass.

    Returns (reconstructed [B, C, H, W] bf16, mu [B, L] f32, logvar [B, L] f32).
    """
    B, C, H, W = x_nchw.shape
    d_in = C * H * W
    assert d_in == packed["d_in"]
    lp, L, hidden = packed["lp"], packed["n_latents"], packed["hidden"]

    # No dtype cast, no batch padding: x streams in at its native dtype.
    x_flat = x_nchw.reshape(B, d_in)

    vmem_cap = _vmem_capacity_bytes()
    vmem_limit = max(32 * 1024 * 1024, min((vmem_cap * 3) // 4, 100 * 1024 * 1024))
    tb = _choose_batch_tile(B, d_in, lp, hidden, x_flat.dtype.itemsize, training,
                            vmem_budget=int(vmem_limit * 0.85))
    nb = pl.cdiv(B, tb)      # partial last block handled by Pallas (masked OOB writes)

    def batch_spec(shape):
        return pl.BlockSpec(shape, lambda i: (i, 0))

    def const_spec(shape):
        return pl.BlockSpec(shape, lambda i: (0, 0))   # VMEM-resident across the grid

    in_args = [x_flat, packed["w1"], packed["b1"], packed["wml"], packed["bml"]]
    in_specs = [batch_spec((tb, d_in)),
                const_spec(packed["w1"].shape), const_spec(packed["b1"].shape),
                const_spec(packed["wml"].shape), const_spec(packed["bml"].shape)]

    if training:
        if eps is None:
            raise ValueError("training=True requires eps of shape [B, n_latents]")
        # Lane-pad only (pad lanes MUST stay zero -- see invariant at top of file).
        eps_pad = jnp.zeros((B, lp), jnp.float32).at[:, :L].set(eps.astype(jnp.float32))
        in_args.append(eps_pad)
        in_specs.append(batch_spec((tb, lp)))
    # eval mode: eps never passed -> no useless HBM->VMEM copy.

    in_args += [packed["wd1"], packed["bd1"], packed["wd2"], packed["bd2"]]
    in_specs += [const_spec(packed["wd1"].shape), const_spec(packed["bd1"].shape),
                 const_spec(packed["wd2"].shape), const_spec(packed["bd2"].shape)]

    rows = nb * tb
    flops = 2 * rows * (d_in * hidden + hidden * 2 * lp + lp * hidden + hidden * d_in)
    transcendentals = rows * (d_in + (lp if training else 0))
    w_bytes = 2 * (d_in * hidden + hidden * 2 * lp + lp * hidden + hidden * d_in) \
        + 4 * (2 * hidden + 2 * lp + d_in)
    act_bytes = rows * (x_flat.dtype.itemsize * d_in + 2 * d_in + 4 * 2 * lp
                        + (4 * lp if training else 0))
    cost = pl.CostEstimate(flops=flops, transcendentals=transcendentals,
                           bytes_accessed=w_bytes + act_bytes)

    recon_flat, stats = pl.pallas_call(
        functools.partial(_betavae_kernel, training, lp),
        grid=(nb,),
        in_specs=in_specs,
        out_specs=(batch_spec((tb, d_in)), batch_spec((tb, 2 * lp))),
        out_shape=(
            jax.ShapeDtypeStruct((B, d_in), jnp.bfloat16),   # bf16 recon slab
            jax.ShapeDtypeStruct((B, 2 * lp), jnp.float32),  # fused lane-dense mu|logvar slab
        ),
        compiler_params=pltpu.CompilerParams(
            dimension_semantics=("parallel",),               # megacore on v7x, no-op v5e/v6e
            vmem_limit_bytes=int(vmem_limit)),
        cost_estimate=cost,
    )(*in_args)

    recon = recon_flat.reshape(B, C, H, W)     # bf16; upcast downstream only if the loss needs f32
    mu = stats[:, :L]
    logvar = stats[:, lp:lp + L]
    return recon, mu, logvar


# ----------------------------------------------------------------------------
# Pure-JAX reference (f32) for correctness checking
# ----------------------------------------------------------------------------
def betavae_reference(params, x_nchw, eps=None, *, training=False):
    B = x_nchw.shape[0]
    d_in = params["w1"].shape[0]
    x = x_nchw.reshape(B, d_in).astype(jnp.float32)
    h = jnp.maximum(x @ params["w1"] + params["b1"], 0.0)
    mu = h @ params["wmu"] + params["bmu"]
    logvar = h @ params["wlv"] + params["blv"]
    z = mu + jnp.exp(0.5 * logvar) * eps if training else mu
    hd = jnp.maximum(z @ params["wd1"] + params["bd1"], 0.0)
    recon = jax.nn.sigmoid(hd @ params["wd2"] + params["bd2"])
    return recon.reshape(x_nchw.shape), mu, logvar


if __name__ == "__main__":
    key = jax.random.PRNGKey(0)
    k_param, k_x, k_eps = jax.random.split(key, 3)

    # Small shapes: batch=2, channels=4, spatial=16x16, n_latents=10, hidden=128
    B, C, H, W = 2, 4, 16, 16
    n_latents = 10

    params = init_betavae_params(k_param, (C, H, W), n_latents=n_latents, hidden=128)
    packed = pack_params(params, n_latents)

    x = jax.random.uniform(k_x, (B, C, H, W), jnp.float32)       # image-like in [0,1)
    eps = jax.random.normal(k_eps, (B, n_latents), jnp.float32)  # reparam noise

    # Eval-mode forward (z = mu), matching model.eval() semantics.
    recon, mu, logvar = betavae_forward(packed, x, training=False)
    jax.block_until_ready((recon, mu, logvar))
    assert recon.shape == (B, C, H, W)
    assert mu.shape == (B, n_latents)
    assert logvar.shape == (B, n_latents)

    r_ref, m_ref, l_ref = betavae_reference(params, x, training=False)
    assert float(jnp.max(jnp.abs(recon.astype(jnp.float32) - r_ref))) < 5e-2
    assert float(jnp.max(jnp.abs(mu - m_ref))) < 5e-2
    assert float(jnp.max(jnp.abs(logvar - l_ref))) < 5e-2

    # Training branch (z = mu + std * eps).
    recon_t, mu_t, logvar_t = betavae_forward(packed, x, eps, training=True)
    jax.block_until_ready((recon_t, mu_t, logvar_t))
    r_t, m_t, l_t = betavae_reference(params, x, eps, training=True)
    assert float(jnp.max(jnp.abs(recon_t.astype(jnp.float32) - r_t))) < 5e-2
    assert float(jnp.max(jnp.abs(mu_t - m_t))) < 5e-2
    assert float(jnp.max(jnp.abs(logvar_t - l_t))) < 5e-2

    print("KERNEL_OK")
</pallas_src>

<mosaic_0001>
module attributes {stable_mosaic.version = 11 : i64} {
  func.func @_betavae_kernel(%arg0: i32, %arg1: memref<2x1024xf32, #tpu.memory_space<vmem>>, %arg2: memref<1024x128xbf16, #tpu.memory_space<vmem>>, %arg3: memref<1x128xf32, #tpu.memory_space<vmem>>, %arg4: memref<128x256xbf16, #tpu.memory_space<vmem>>, %arg5: memref<1x256xf32, #tpu.memory_space<vmem>>, %arg6: memref<128x128xbf16, #tpu.memory_space<vmem>>, %arg7: memref<1x128xf32, #tpu.memory_space<vmem>>, %arg8: memref<128x1024xbf16, #tpu.memory_space<vmem>>, %arg9: memref<1x1024xf32, #tpu.memory_space<vmem>>, %arg10: memref<2x1024xbf16, #tpu.memory_space<vmem>>, %arg11: memref<2x256xf32, #tpu.memory_space<vmem>>) attributes {dimension_semantics = [#tpu.dimension_semantics<parallel>], iteration_bounds = array<i64: 1>, scalar_prefetch = 0 : i64, scratch_operands = 0 : i64, tpu.core_type = #tpu.core_type<tc>, window_params = [{transform_indices = @transform_0, window_bounds = array<i64: 2, 1024>}, {pipeline_mode = #tpu.pipeline_mode<synchronous>, transform_indices = @transform_1, window_bounds = array<i64: 1024, 128>}, {pipeline_mode = #tpu.pipeline_mode<synchronous>, transform_indices = @transform_2, window_bounds = array<i64: 1, 128>}, {pipeline_mode = #tpu.pipeline_mode<synchronous>, transform_indices = @transform_3, window_bounds = array<i64: 128, 256>}, {pipeline_mode = #tpu.pipeline_mode<synchronous>, transform_indices = @transform_4, window_bounds = array<i64: 1, 256>}, {pipeline_mode = #tpu.pipeline_mode<synchronous>, transform_indices = @transform_5, window_bounds = array<i64: 128, 128>}, {pipeline_mode = #tpu.pipeline_mode<synchronous>, transform_indices = @transform_6, window_bounds = array<i64: 1, 128>}, {pipeline_mode = #tpu.pipeline_mode<synchronous>, transform_indices = @transform_7, window_bounds = array<i64: 128, 1024>}, {pipeline_mode = #tpu.pipeline_mode<synchronous>, transform_indices = @transform_8, window_bounds = array<i64: 1, 1024>}, {transform_indices = @transform_9, window_bounds = array<i64: 2, 1024>}, {transform_indices = @transform_10, window_bounds = array<i64: 2, 256>}]} {
    %c0 = arith.constant 0 : index
    %c0_0 = arith.constant 0 : index
    %0 = vector.load %arg1[%c0, %c0_0] : memref<2x1024xf32, #tpu.memory_space<vmem>>, vector<2x1024xf32>
    %1 = arith.truncf %0 : vector<2x1024xf32> to vector<2x1024xbf16>
    %c0_1 = arith.constant 0 : index
    %c0_2 = arith.constant 0 : index
    %2 = vector.load %arg2[%c0_1, %c0_2] : memref<1024x128xbf16, #tpu.memory_space<vmem>>, vector<1024x128xbf16>
    %cst = arith.constant dense<0.000000e+00> : vector<2x128xf32>
    %3 = tpu.matmul %1, %2, %cst {dimension_numbers = #tpu.dot_dimension_numbers<[1], [0], [0], [1], [0, 0, 1, 1], [], []>} : vector<2x1024xbf16>, vector<1024x128xbf16>, vector<2x128xf32> -> vector<2x128xf32>
    %c0_3 = arith.constant 0 : index
    %c0_4 = arith.constant 0 : index
    %4 = vector.load %arg3[%c0_3, %c0_4] : memref<1x128xf32, #tpu.memory_space<vmem>>, vector<1x128xf32>
    %5 = vector.broadcast %4 : vector<1x128xf32> to vector<2x128xf32>
    %6 = arith.addf %3, %5 : vector<2x128xf32>
    %cst_5 = arith.constant 0.000000e+00 : f32
    %7 = vector.broadcast %cst_5 : f32 to vector<2x128xf32>
    %8 = arith.maximumf %6, %7 : vector<2x128xf32>
    %9 = arith.truncf %8 : vector<2x128xf32> to vector<2x128xbf16>
    %c0_6 = arith.constant 0 : index
    %c0_7 = arith.constant 0 : index
    %10 = vector.load %arg4[%c0_6, %c0_7] : memref<128x256xbf16, #tpu.memory_space<vmem>>, vector<128x256xbf16>
    %cst_8 = arith.constant dense<0.000000e+00> : vector<2x256xf32>
    %11 = tpu.matmul %9, %10, %cst_8 {dimension_numbers = #tpu.dot_dimension_numbers<[1], [0], [0], [1], [0, 0, 1, 1], [], []>} : vector<2x128xbf16>, vector<128x256xbf16>, vector<2x256xf32> -> vector<2x256xf32>
    %c0_9 = arith.constant 0 : index
    %c0_10 = arith.constant 0 : index
    %12 = vector.load %arg5[%c0_9, %c0_10] : memref<1x256xf32, #tpu.memory_space<vmem>>, vector<1x256xf32>
    %13 = vector.broadcast %12 : vector<1x256xf32> to vector<2x256xf32>
    %14 = arith.addf %11, %13 : vector<2x256xf32>
    %15 = vector.extract_strided_slice %14 {offsets = [0, 0], sizes = [2, 128], strides = [1, 1]} : vector<2x256xf32> to vector<2x128xf32>
    %16 = arith.truncf %15 : vector<2x128xf32> to vector<2x128xbf16>
    %c0_11 = arith.constant 0 : index
    %c0_12 = arith.constant 0 : index
    %17 = vector.load %arg6[%c0_11, %c0_12] : memref<128x128xbf16, #tpu.memory_space<vmem>>, vector<128x128xbf16>
    %cst_13 = arith.constant dense<0.000000e+00> : vector<2x128xf32>
    %18 = tpu.matmul %16, %17, %cst_13 {dimension_numbers = #tpu.dot_dimension_numbers<[1], [0], [0], [1], [0, 0, 1, 1], [], []>} : vector<2x128xbf16>, vector<128x128xbf16>, vector<2x128xf32> -> vector<2x128xf32>
    %c0_14 = arith.constant 0 : index
    %c0_15 = arith.constant 0 : index
    %19 = vector.load %arg7[%c0_14, %c0_15] : memref<1x128xf32, #tpu.memory_space<vmem>>, vector<1x128xf32>
    %20 = vector.broadcast %19 : vector<1x128xf32> to vector<2x128xf32>
    %21 = arith.addf %18, %20 : vector<2x128xf32>
    %cst_16 = arith.constant 0.000000e+00 : f32
    %22 = vector.broadcast %cst_16 : f32 to vector<2x128xf32>
    %23 = arith.maximumf %21, %22 : vector<2x128xf32>
    %24 = arith.truncf %23 : vector<2x128xf32> to vector<2x128xbf16>
    %c0_17 = arith.constant 0 : index
    %c0_18 = arith.constant 0 : index
    %25 = vector.load %arg8[%c0_17, %c0_18] : memref<128x1024xbf16, #tpu.memory_space<vmem>>, vector<128x1024xbf16>
    %cst_19 = arith.constant dense<0.000000e+00> : vector<2x1024xf32>
    %26 = tpu.matmul %24, %25, %cst_19 {dimension_numbers = #tpu.dot_dimension_numbers<[1], [0], [0], [1], [0, 0, 1, 1], [], []>} : vector<2x128xbf16>, vector<128x1024xbf16>, vector<2x1024xf32> -> vector<2x1024xf32>
    %c0_20 = arith.constant 0 : index
    %c0_21 = arith.constant 0 : index
    %27 = vector.load %arg9[%c0_20, %c0_21] : memref<1x1024xf32, #tpu.memory_space<vmem>>, vector<1x1024xf32>
    %28 = vector.broadcast %27 : vector<1x1024xf32> to vector<2x1024xf32>
    %29 = arith.addf %26, %28 : vector<2x1024xf32>
    %cst_22 = arith.constant 0.000000e+00 : f32
    %30 = vector.broadcast %cst_22 : f32 to vector<2x1024xf32>
    %31 = arith.subf %30, %29 : vector<2x1024xf32>
    %32 = math.exp %31 : vector<2x1024xf32>
    %cst_23 = arith.constant 1.000000e+00 : f32
    %33 = vector.broadcast %cst_23 : f32 to vector<2x1024xf32>
    %34 = arith.addf %33, %32 : vector<2x1024xf32>
    %35 = tpu.reciprocal %34 {approx = true} : vector<2x1024xf32> -> vector<2x1024xf32>
    %36 = arith.truncf %35 : vector<2x1024xf32> to vector<2x1024xbf16>
    %c0_24 = arith.constant 0 : index
    %c0_25 = arith.constant 0 : index
    %37 = vector.load %arg10[%c0_24, %c0_25] : memref<2x1024xbf16, #tpu.memory_space<vmem>>, vector<2x1024xbf16>
    tpu.vector_store %arg10[%c0_24, %c0_25], %36 {strides = array<i32>} : memref<2x1024xbf16, #tpu.memory_space<vmem>>, vector<2x1024xbf16>,
    %c0_26 = arith.constant 0 : index
    %c0_27 = arith.constant 0 : index
    %38 = vector.load %arg11[%c0_26, %c0_27] : memref<2x256xf32, #tpu.memory_space<vmem>>, vector<2x256xf32>
    tpu.vector_store %arg11[%c0_26, %c0_27], %14 {strides = array<i32>} : memref<2x256xf32, #tpu.memory_space<vmem>>, vector<2x256xf32>,
    return
  }
  func.func @transform_0(%arg0: i32) -> (i32, i32) {
    %c0_i32 = arith.constant 0 : i32
    %c0_i32_0 = arith.constant 0 : i32
    return %arg0, %c0_i32 : i32, i32
  }
  func.func @transform_1(%arg0: i32) -> (i32, i32) {
    %c0_i32 = arith.constant 0 : i32
    %c0_i32_0 = arith.constant 0 : i32
    %c0_i32_1 = arith.constant 0 : i32
    return %c0_i32, %c0_i32_0 : i32, i32
  }
  func.func @transform_2(%arg0: i32) -> (i32, i32) {
    %c0_i32 = arith.constant 0 : i32
    %c0_i32_0 = arith.constant 0 : i32
    %c0_i32_1 = arith.constant 0 : i32
    return %c0_i32, %c0_i32_0 : i32, i32
  }
  func.func @transform_3(%arg0: i32) -> (i32, i32) {
    %c0_i32 = arith.constant 0 : i32
    %c0_i32_0 = arith.constant 0 : i32
    %c0_i32_1 = arith.constant 0 : i32
    return %c0_i32, %c0_i32_0 : i32, i32
  }
  func.func @transform_4(%arg0: i32) -> (i32, i32) {
    %c0_i32 = arith.constant 0 : i32
    %c0_i32_0 = arith.constant 0 : i32
    %c0_i32_1 = arith.constant 0 : i32
    return %c0_i32, %c0_i32_0 : i32, i32
  }
  func.func @transform_5(%arg0: i32) -> (i32, i32) {
    %c0_i32 = arith.constant 0 : i32
    %c0_i32_0 = arith.constant 0 : i32
    %c0_i32_1 = arith.constant 0 : i32
    return %c0_i32, %c0_i32_0 : i32, i32
  }
  func.func @transform_6(%arg0: i32) -> (i32, i32) {
    %c0_i32 = arith.constant 0 : i32
    %c0_i32_0 = arith.constant 0 : i32
    %c0_i32_1 = arith.constant 0 : i32
    return %c0_i32, %c0_i32_0 : i32, i32
  }
  func.func @transform_7(%arg0: i32) -> (i32, i32) {
    %c0_i32 = arith.constant 0 : i32
    %c0_i32_0 = arith.constant 0 : i32
    %c0_i32_1 = arith.constant 0 : i32
    return %c0_i32, %c0_i32_0 : i32, i32
  }
  func.func @transform_8(%arg0: i32) -> (i32, i32) {
    %c0_i32 = arith.constant 0 : i32
    %c0_i32_0 = arith.constant 0 : i32
    %c0_i32_1 = arith.constant 0 : i32
    return %c0_i32, %c0_i32_0 : i32, i32
  }
  func.func @transform_9(%arg0: i32) -> (i32, i32) {
    %c0_i32 = arith.constant 0 : i32
    %c0_i32_0 = arith.constant 0 : i32
    return %arg0, %c0_i32 : i32, i32
  }
  func.func @transform_10(%arg0: i32) -> (i32, i32) {
    %c0_i32 = arith.constant 0 : i32
    %c0_i32_0 = arith.constant 0 : i32
    return %arg0, %c0_i32 : i32, i32
  }
}

</mosaic_0001>

<bundles_post_ra>
// kernel: tpu_custom_call.1
= control target key start
LH: loop header
LB: loop body
LE: loop exit
PB: predicated region body
PF: predicated region fallthrough
CT: control target
= control target key end

     0   :  { %16 = vsyncpa [#allocation3], 0  ;;  %s2639_s0 = inlined_call_operand.hbm [shape: f32[2,1024], index: 0, kind: input, shape index: {}]   ;;  %s2640_s1 = inlined_call_operand.hbm [shape: bf16[1024,128], index: 1, kind: input, shape index: {}]   ;;  %s2641_s2 = inlined_call_operand.vmem [shape: f32[1,128], index: 2, kind: input, shape index: {}]   ;;  %s2642_s3 = inlined_call_operand.hbm [shape: bf16[128,256], index: 3, kind: input, shape index: {}]   ;;  %s2643_s4 = inlined_call_operand.vmem [shape: f32[1,256], index: 4, kind: input, shape index: {}]   ;;  %s2644_s5 = inlined_call_operand.hbm [shape: bf16[128,128], index: 5, kind: input, shape index: {}]   ;;  %s2645_s6 = inlined_call_operand.vmem [shape: f32[1,128], index: 6, kind: input, shape index: {}]   ;;  %s2646_s7 = inlined_call_operand.hbm [shape: bf16[128,1024], index: 7, kind: input, shape index: {}]   ;;  %s2647_s8 = inlined_call_operand.vmem [shape: f32[1,1024], index: 8, kind: input, shape index: {}]   ;;  %s2648_s9 = inlined_call_operand.hbm [shape: bf16[2,1024], index: 9, kind: output, shape index: {0}]   ;;  %s2649_s10 = inlined_call_operand.hbm [shape: f32[2,256], index: 10, kind: output, shape index: {1}]  }
   0x1   :  { %17 = vsyncpa [#allocation6], 0 }
   0x2   :  { %18 = vsyncpa [#allocation9], 0 }
   0x3   :  { %19 = vsyncpa [#allocation4], 0 }
   0x4   :  { %20 = vsyncpa [#allocation13], 0  ;;  %s2429_s13 = smov [#allocation5]   ;;  %s2265_s17 = scalar_lea.hbm %s2640_s1, 8192 }
   0x5   :  { %s36_s14 = sshll.u32 %s2429_s13, 4  ;;  %p2266_p0 = scmp.ne.s32.totalorder %s2640_s1, %s2265_s17  ;;  %s37_s14 = int_to_ptr.vmem [resolvable:$true] %s36_s14 }
   0x6   :  { %p2269_p1 = scmp.lt.u32.totalorder %s2265_s17, %s2640_s1 }
   0x8   :  { %p2271_p2 = pnand %p2269_p1, %p2266_p0 }
   0xa   :  { %2274 = shalt.err (!%p2271_p2)
}
   0xb   :  { %s2275_s22 = scalar_lea.vmem %s37_s14, 8192  ;;  %p2280_p4 = scmp.lt.s32.totalorder %s37_s14, %s37_s14 }
   0xc   :  { %p2276_p3 = scmp.ne.s32.totalorder %s37_s14, %s2275_s22  ;;  %p2281_p5 = scmp.lt.s32.totalorder %s2275_s22, %s2275_s22 }
   0xe   :  { %p2282_p6 = por %p2281_p5, %p2280_p4 }
  0x10   :  { %p2283_p7 = pnand %p2282_p6, %p2276_p3 }
  0x12   :  { %2286 = shalt.err (!%p2283_p7)
}
  0x13   :  { %s2430_s23 = smov 64   ;;  %s2431_s24 = smov 4  }
  0x14   :  { %42 = dma.hbm_to_vmem [thread:$0]  %s2640_s1, 8192, %s37_s14, [#allocation6], %s2430_s23, %s2430_s23, %s2431_s24  }
  0x15   :  { %s2432_s27 = smov [#allocation8]   ;;  %s2433_s29 = smov [#allocation2]  }
  0x16   :  { %s64_s28 = sshll.u32 %s2432_s27, 4  ;;  %s27_s30 = sshll.u32 %s2433_s29, 4  ;;  %s65_s28 = int_to_ptr.vmem [resolvable:$true] %s64_s28  ;;  %s28_s30 = int_to_ptr.vmem [resolvable:$true] %s27_s30 }
  0x17   :  { %s2287_s13 = scalar_lea.hbm %s2644_s5, 1024 }
  0x18   :  { %p2288_p8 = scmp.ne.s32.totalorder %s2644_s5, %s2287_s13  ;;  %p2291_p9 = scmp.lt.u32.totalorder %s2287_s13, %s2644_s5 }
  0x1a   :  { %p2293_p10 = pnand %p2291_p9, %p2288_p8 }
  0x1c   :  { %2296 = shalt.err (!%p2293_p10)
}
  0x1d   :  { %s2297_s1 = scalar_lea.vmem %s65_s28, 1024  ;;  %p2302_p12 = scmp.lt.s32.totalorder %s65_s28, %s65_s28 }
  0x1e   :  { %p2298_p11 = scmp.ne.s32.totalorder %s65_s28, %s2297_s1  ;;  %p2303_p13 = scmp.lt.s32.totalorder %s2297_s1, %s2297_s1 }
  0x20   :  { %p2304_p0 = por %p2303_p13, %p2302_p12 }
  0x22   :  { %p2305_p1 = pnand %p2304_p0, %p2298_p11 }
  0x24   :  { %2308 = shalt.err (!%p2305_p1)
}
  0x25   :  { %70 = dma.hbm_to_vmem [thread:$0]  %s2644_s5, 1024, %s65_s28, [#allocation9], %s2430_s23, %s2430_s23, %s2431_s24  }
  0x26   :  { %s2309_s22 = scalar_lea.hbm %s2639_s0, 256 }
  0x27   :  { %p2310_p2 = scmp.ne.s32.totalorder %s2639_s0, %s2309_s22  ;;  %p2313_p3 = scmp.lt.u32.totalorder %s2309_s22, %s2639_s0 }
  0x29   :  { %p2315_p4 = pnand %p2313_p3, %p2310_p2 }
  0x2b   :  { %2318 = shalt.err (!%p2315_p4)
}
  0x2c   :  { %s2319_s11 = scalar_lea.vmem %s28_s30, 256  ;;  %p2324_p6 = scmp.lt.s32.totalorder %s28_s30, %s28_s30 }
  0x2d   :  { %p2320_p5 = scmp.ne.s32.totalorder %s28_s30, %s2319_s11  ;;  %p2325_p7 = scmp.lt.s32.totalorder %s2319_s11, %s2319_s11 }
  0x2f   :  { %p2326_p8 = por %p2325_p7, %p2324_p6 }
  0x31   :  { %p2327_p9 = pnand %p2326_p8, %p2320_p5 }
  0x33   :  { %2330 = shalt.err (!%p2327_p9)
}
  0x34   :  { %30 = dma.hbm_to_vmem [thread:$0]  %s2639_s0, 256, %s28_s30, [#allocation3]  }
  0x35   :  { %s2434_s24 = smov [#allocation7]   ;;  %s2331_s15 = scalar_lea.hbm %s2642_s3, 2048 }
  0x36   :  { %s50_s28 = sshll.u32 %s2434_s24, 4  ;;  %p2332_p10 = scmp.ne.s32.totalorder %s2642_s3, %s2331_s15  ;;  %s51_s28 = int_to_ptr.vmem [resolvable:$true] %s50_s28 }
  0x37   :  { %p2335_p11 = scmp.lt.u32.totalorder %s2331_s15, %s2642_s3 }
  0x39   :  { %p2337_p12 = pnand %p2335_p11, %p2332_p10 }
  0x3b   :  { %2340 = shalt.err (!%p2337_p12)
}
  0x3c   :  { %s2341_s14 = scalar_lea.vmem %s51_s28, 2048  ;;  %p2346_p0 = scmp.lt.s32.totalorder %s51_s28, %s51_s28 }
  0x3d   :  { %p2342_p13 = scmp.ne.s32.totalorder %s51_s28, %s2341_s14  ;;  %p2347_p1 = scmp.lt.s32.totalorder %s2341_s14, %s2341_s14 }
  0x3f   :  { %p2348_p2 = por %p2347_p1, %p2346_p0 }
  0x41   :  { %p2349_p3 = pnand %p2348_p2, %p2342_p13 }
  0x43   :  { %2352 = shalt.err (!%p2349_p3)
}
  0x44   :  { %s2435_s0 = smov 128   ;;  %s2436_s30 = smov 8  }
  0x45   :  { %56 = dma.hbm_to_vmem [thread:$0]  %s2642_s3, 2048, %s51_s28, [#allocation6], %s2435_s0, %s2435_s0, %s2436_s30  }
  0x46   :  { %s2437_s21 = smov [#allocation10]   ;;  %s2353_s27 = scalar_lea.hbm %s2646_s7, 8192 }
  0x47   :  { %s78_s22 = sshll.u32 %s2437_s21, 4  ;;  %p2354_p4 = scmp.ne.s32.totalorder %s2646_s7, %s2353_s27  ;;  %s79_s22 = int_to_ptr.vmem [resolvable:$true] %s78_s22 }
  0x48   :  { %p2357_p5 = scmp.lt.u32.totalorder %s2353_s27, %s2646_s7 }
  0x4a   :  { %p2359_p6 = pnand %p2357_p5, %p2354_p4 }
  0x4c   :  { %2362 = shalt.err (!%p2359_p6)
}
  0x4d   :  { %s2363_s24 = scalar_lea.vmem %s79_s22, 8192  ;;  %p2368_p8 = scmp.lt.s32.totalorder %s79_s22, %s79_s22 }
  0x4e   :  { %p2364_p7 = scmp.ne.s32.totalorder %s79_s22, %s2363_s24  ;;  %p2369_p9 = scmp.lt.s32.totalorder %s2363_s24, %s2363_s24 }
  0x50   :  { %p2370_p10 = por %p2369_p9, %p2368_p8 }
  0x52   :  { %p2371_p11 = pnand %p2370_p10, %p2364_p7 }
  0x54   :  { %2374 = shalt.err (!%p2371_p11)
}
  0x55   :  { %s2438_s3 = smov 512   ;;  %s2439_s28 = smov 32  }
  0x56   :  { %84 = dma.hbm_to_vmem [thread:$0]  %s2646_s7, 8192, %s79_s22, [#allocation9], %s2438_s3, %s2438_s3, %s2439_s28  }
  0x57   :  { %2419 = dma.done.wait [#allocation3], 256  }
  0x58   :  { %2420 = vsyncadd [#allocation3], 4294967040 }
  0x59   :  { %2421 = dma.done.wait [#allocation6], 10240  }
  0x5a   :  { %2422 = vsyncadd [#allocation6], 4294957056 }
  0x5b   :  { %2423 = dma.done.wait [#allocation9], 9216  }
  0x5c   :  { %2424 = vsyncadd [#allocation9], 4294958080  ;;  %v2135_v0 = vld [vmem:[#allocation5 + $0x40] sm:$0xff]   ;;  %v2139_v4 = vld [vmem:[#allocation5 + $0x48] sm:$0xff]   ;;  %v2440_v22 = vmov 1983009808   ;;  %v111_v24 = vlaneseq }
  0x5d   :  { %v2136_v1 = vld [vmem:[#allocation5 + $0xc0] sm:$0xff]   ;;  %2000 = vmatprep.subr.bf16.mxu0 %v2135_v0  ;;  %v2140_v5 = vld [vmem:[#allocation5 + $0xc8] sm:$0xff]   ;;  %v2143_v8 = vld [vmem:[#allocation5 + $0x50] sm:$0xff]   ;;  %v109_v23 = vunpack.c.l.s4 %v2440_v22  ;;  %vm2443_vm0 = vmmov 0  }
  0x5e   :  { %v2137_v2 = vld [vmem:[#allocation5] sm:$0xff]   ;;  %2022 = vmatprep.subr.bf16.mxu1 %v2136_v1  ;;  %v2141_v6 = vld [vmem:[#allocation5 + $0x8] sm:$0xff]   ;;  %v2144_v9 = vld [vmem:[#allocation5 + $0xd0] sm:$0xff]   ;;  %v2562_v30 = vshrl.u32 %v111_v24, 7 }
  0x5f   :  { %v2138_v3 = vld [vmem:[#allocation5 + $0x80] sm:$0xff]   ;;  %2001 = vmatpush3.bf16.msra.mxu0 %v2137_v2  ;;  %v2142_v7 = vld [vmem:[#allocation5 + $0x88] sm:$0xff]   ;;  %v2145_v10 = vld [vmem:[#allocation5 + $0x10] sm:$0xff]   ;;  %v110_v29 = vunpack.c.0.s8 %v109_v23 }
  0x60   :  { %2023 = vmatpush3.bf16.msra.mxu1 %v2138_v3  ;;  %2002 = vmatprep.subr.bf16.mxu0 %v2139_v4  ;;  %v2146_v11 = vld [vmem:[#allocation5 + $0x90] sm:$0xff]   ;;  %v2147_v12 = vld [vmem:[#allocation5 + $0x58] sm:$0xff]   ;;  %v2151_v16 = vld [vmem:[#allocation5 + $0x60] sm:$0xff]  }
  0x61   :  { %2024 = vmatprep.subr.bf16.mxu1 %v2140_v5  ;;  %v2148_v13 = vld [vmem:[#allocation5 + $0xd8] sm:$0xff]   ;;  %v2152_v17 = vld [vmem:[#allocation5 + $0xe0] sm:$0xff]   ;;  %v2155_v20 = vld [vmem:[#allocation5 + $0x68] sm:$0xff]   ;;  %v2565_v35 = vsub.s32 %v110_v29, %v2562_v30 }
  0x62   :  { %v2149_v14 = vld [vmem:[#allocation5 + $0x18] sm:$0xff]   ;;  %v2153_v18 = vld [vmem:[#allocation5 + $0x20] sm:$0xff]   ;;  %v2156_v21 = vld [vmem:[#allocation5 + $0xe8] sm:$0xff]  }
  0x63   :  { %2003 = vmatpush3.bf16.msra.mxu0 %v2141_v6  ;;  %v2150_v15 = vld [vmem:[#allocation5 + $0x98] sm:$0xff]   ;;  %v2154_v19 = vld [vmem:[#allocation5 + $0xa0] sm:$0xff]   ;;  %v2157_v25 = vld [vmem:[#allocation5 + $0x28] sm:$0xff]  }
  0x64   :  { %2025 = vmatpush3.bf16.msra.mxu1 %v2142_v7  ;;  %2004 = vmatprep.subr.bf16.mxu0 %v2143_v8  ;;  %v2158_v26 = vld [vmem:[#allocation5 + $0xa8] sm:$0xff]   ;;  %v2159_v27 = vld [vmem:[#allocation5 + $0x70] sm:$0xff]   ;;  %v2163_v33 = vld [vmem:[#allocation5 + $0x78] sm:$0xff]  }
  0x65   :  { %2026 = vmatprep.subr.bf16.mxu1 %v2144_v9  ;;  %v2160_v28 = vld [vmem:[#allocation5 + $0xf0] sm:$0xff]   ;;  %v2164_v34 = vld [vmem:[#allocation5 + $0xf8] sm:$0xff]   ;;  %v2168_v41 = vld [vmem:[#allocation5 + $0x140] sm:$0xff]  }
  0x66   :  { %v2161_v31 = vld [vmem:[#allocation5 + $0x30] sm:$0xff]   ;;  %v2165_v36 = vld [vmem:[#allocation5 + $0x38] sm:$0xff]   ;;  %v2169_v42 = vld [vmem:[#allocation5 + $0x1c0] sm:$0xff]  }
  0x67   :  { %2005 = vmatpush3.bf16.msra.mxu0 %v2145_v10  ;;  %v2162_v32 = vld [vmem:[#allocation5 + $0xb0] sm:$0xff]   ;;  %v2166_v37 = vld [vmem:[#allocation5 + $0xb8] sm:$0xff]   ;;  %v2170_v46 = vld [vmem:[#allocation5 + $0x100] sm:$0xff]  }
  0x68   :  { %2027 = vmatpush3.bf16.msra.mxu1 %v2146_v11  ;;  %2006 = vmatprep.subr.bf16.mxu0 %v2147_v12  ;;  %v103_v38 = vld [vmem:[#allocation2] sm:$0xff]  ;;  %v2171_v49 = vld [vmem:[#allocation5 + $0x180] sm:$0xff]   ;;  %v2172_v51 = vld [vmem:[#allocation5 + $0x148] sm:$0xff]  }
  0x69   :  { %2028 = vmatprep.subr.bf16.mxu1 %v2148_v13  ;;  %v114_v39 = vrot.slane %v103_v38, %v2565_v35  ;;  %v107_v40 = vcombine.high %v103_v38, %v103_v38  ;;  %v2173_v53 = vld [vmem:[#allocation5 + $0x1c8] sm:$0xff]   ;;  %v2176_v56 = vld [vmem:[#allocation5 + $0x150] sm:$0xff]   ;;  %v2180_v60 = vld [vmem:[#allocation5 + $0x158] sm:$0xff]  }
  0x6a   :  { %v2174_v54 = vld [vmem:[#allocation5 + $0x108] sm:$0xff]   ;;  %v2177_v57 = vld [vmem:[#allocation5 + $0x1d0] sm:$0xff]   ;;  %v2181_v61 = vld [vmem:[#allocation5 + $0x1d8] sm:$0xff]  }
  0x6b   :  { %2007 = vmatpush3.bf16.msra.mxu0 %v2149_v14  ;;  %v122_v43 = vcombine.high %v114_v39, %v114_v39  ;;  %v121_v44 = vrot.slane %v107_v40, %v2565_v35  ;;  %v149_v45 = vpack.c.bf16 %v114_v39, %v114_v39  ;;  %v2175_v55 = vld [vmem:[#allocation5 + $0x188] sm:$0xff]   ;;  %v2178_v58 = vld [vmem:[#allocation5 + $0x110] sm:$0xff]   ;;  %v2182_v62 = vld [vmem:[#allocation5 + $0x118] sm:$0xff]  }
  0x6c   :  { %2029 = vmatpush3.bf16.msra.mxu1 %v2150_v15  ;;  %2008 = vmatprep.subr.bf16.mxu0 %v2151_v16  ;;  %v2179_v59 = vld [vmem:[#allocation5 + $0x190] sm:$0xff]   ;;  %v2183_v63 = vld [vmem:[#allocation5 + $0x198] sm:$0xff]   ;;  %v2184_v0 = vld [vmem:[#allocation5 + $0x160] sm:$0xff]  }
  0x6d   :  { %2030 = vmatprep.subr.bf16.mxu1 %v2152_v17  ;;  %v150_v47 = vpack.c.bf16 %v122_v43, %v122_v43  ;;  %v123_v48 = vcombine.high %v121_v44, %v121_v44  ;;  %v151_v50 = vpack.c.bf16 %v121_v44, %v121_v44  ;;  %v2185_v1 = vld [vmem:[#allocation5 + $0x1e0] sm:$0xff]   ;;  %v2188_v4 = vld [vmem:[#allocation5 + $0x168] sm:$0xff]   ;;  %v2192_v8 = vld [vmem:[#allocation5 + $0x170] sm:$0xff]   ;;  %v2441_v43 = vmov 0  }
  0x6e   :  { %v2186_v2 = vld [vmem:[#allocation5 + $0x120] sm:$0xff]   ;;  %v2189_v5 = vld [vmem:[#allocation5 + $0x1e8] sm:$0xff]   ;;  %v2193_v9 = vld [vmem:[#allocation5 + $0x1f0] sm:$0xff]  }
  0x6f   :  { %2009 = vmatpush3.bf16.msra.mxu0 %v2153_v18  ;;  %708 = vmatprep.mubr.bf16.mxu0 %v150_v47  ;;  %v152_v52 = vpack.c.bf16 %v123_v48, %v123_v48  ;;  %v2187_v3 = vld [vmem:[#allocation5 + $0x1a0] sm:$0xff]   ;;  %v2190_v6 = vld [vmem:[#allocation5 + $0x128] sm:$0xff]   ;;  %v2194_v10 = vld [vmem:[#allocation5 + $0x130] sm:$0xff]  }
  0x70   :  { %2031 = vmatpush3.bf16.msra.mxu1 %v2154_v19  ;;  %2010 = vmatprep.subr.bf16.mxu0 %v2155_v20  ;;  %v2191_v7 = vld [vmem:[#allocation5 + $0x1a8] sm:$0xff]   ;;  %v2195_v11 = vld [vmem:[#allocation5 + $0x1b0] sm:$0xff]   ;;  %v2196_v12 = vld [vmem:[#allocation5 + $0x178] sm:$0xff]  }
  0x71   :  { %2032 = vmatprep.subr.bf16.mxu1 %v2156_v21  ;;  %748 = vmatprep.mubr.bf16.mxu1 %v152_v52  ;;  %v2197_v13 = vld [vmem:[#allocation5 + $0x1f8] sm:$0xff]   ;;  %v2221_v39 = vld [vmem:[#allocation7 + $0x64] ss:$8 sps:$4 sm:$0xff]   ;;  %v2219_v40 = vld [vmem:[#allocation7 + $0x60] ss:$8 sps:$4 sm:$0xff]  }
  0x72   :  { %v2198_v14 = vld [vmem:[#allocation5 + $0x138] sm:$0xff]   ;;  %v2225_v44 = vld [vmem:[#allocation8] sm:$0xff]   ;;  %v2227_v47 = vld [vmem:[#allocation8 + $0x10] sm:$0xff]  }
  0x73   :  { %2011 = vmatpush3.bf16.msra.mxu0 %v2157_v25  ;;  %v104_v15 = vld [vmem:[#allocation2 + $0x8] sm:$0xff] }
  0x74   :  { %2033 = vmatpush3.bf16.msra.mxu1 %v2158_v26  ;;  %2012 = vmatprep.subr.bf16.mxu0 %v2159_v27  ;;  %v2199_v16 = vld [vmem:[#allocation5 + $0x1b8] sm:$0xff]   ;;  %v131_v17 = vrot.slane %v104_v15, %v2565_v35  ;;  %v124_v18 = vcombine.high %v104_v15, %v104_v15  ;;  %v2201_v26 = vld [vmem:[#allocation7] ss:$8 sps:$4 sm:$0xff]   ;;  %v2203_v27 = vld [vmem:[#allocation7 + $0x4] ss:$8 sps:$4 sm:$0xff]  }
  0x75   :  { %2034 = vmatprep.subr.bf16.mxu1 %v2160_v28  ;;  %v2206_v28 = vld [vmem:[#allocation7 + $0x14] ss:$8 sps:$4 sm:$0xff]   ;;  %v2204_v29 = vld [vmem:[#allocation7 + $0x10] ss:$8 sps:$4 sm:$0xff]  }
  0x76   :  { %v139_v19 = vcombine.high %v131_v17, %v131_v17  ;;  %v138_v20 = vrot.slane %v124_v18, %v2565_v35  ;;  %v153_v21 = vpack.c.bf16 %v131_v17, %v131_v17  ;;  %v2215_v35 = vld [vmem:[#allocation7 + $0x44] ss:$8 sps:$4 sm:$0xff]   ;;  %v2216_v38 = vld [vmem:[#allocation7 + $0x50] ss:$8 sps:$4 sm:$0xff]  }
  0x77   :  { %2013 = vmatpush3.bf16.msra.mxu0 %v2161_v31  ;;  %v2209_v31 = vld [vmem:[#allocation7 + $0x24] ss:$8 sps:$4 sm:$0xff]   ;;  %v2228_v48 = vld [vmem:[#allocation8 + $0x18] sm:$0xff]  }
  0x78   :  { %2035 = vmatpush3.bf16.msra.mxu1 %v2162_v32  ;;  %2014 = vmatprep.subr.bf16.mxu0 %v2163_v33  ;;  %v154_v22 = vpack.c.bf16 %v139_v19, %v139_v19  ;;  %v140_v23 = vcombine.high %v138_v20, %v138_v20  ;;  %v155_v24 = vpack.c.bf16 %v138_v20, %v138_v20  ;;  %v2207_v32 = vld [vmem:[#allocation7 + $0x20] ss:$8 sps:$4 sm:$0xff]   ;;  %v2212_v33 = vld [vmem:[#allocation7 + $0x34] ss:$8 sps:$4 sm:$0xff]  }
  0x79   :  { %2036 = vmatprep.subr.bf16.mxu1 %v2164_v34  ;;  %v2210_v34 = vld [vmem:[#allocation7 + $0x30] ss:$8 sps:$4 sm:$0xff]   ;;  %v1105_v17 = vld [vmem:[#allocation10 + $0x20] sm:$0xff]  ;;  %v2576_v18 = vld [vmem:[#allocation10 + $0x8] sm:$0xff] }
  0x7a   :  { %v156_v25 = vpack.c.bf16 %v140_v23, %v140_v23  ;;  %v2232_v15 = vld [vmem:[#allocation8 + $0x38] sm:$0xff]   ;;  %v1113_v23 = vld [vmem:[#allocation10 + $0x60] sm:$0xff] }
  0x7b   :  { %2015 = vmatpush3.bf16.msra.mxu0 %v2165_v36  ;;  %v2213_v36 = vld [vmem:[#allocation7 + $0x40] ss:$8 sps:$4 sm:$0xff]  }
  0x7c   :  { %2037 = vmatpush3.bf16.msra.mxu1 %v2166_v37  ;;  %2044 = vmatprep.subr.bf16.mxu0 %v2168_v41  ;;  %v2218_v37 = vld [vmem:[#allocation7 + $0x54] ss:$8 sps:$4 sm:$0xff]  }
  0x7d   :  { %2066 = vmatprep.subr.bf16.mxu1 %v2169_v42  ;;  %v2224_v41 = vld [vmem:[#allocation7 + $0x74] ss:$8 sps:$4 sm:$0xff]   ;;  %v2222_v42 = vld [vmem:[#allocation7 + $0x70] ss:$8 sps:$4 sm:$0xff]  }
  0x7e   :  { %709 = vmatmul.mubr.bf16.vlgmr.msra.gmra.mrb[0].mxu0 %v149_v45  ;;  %v2442_v45 = vmov 0.0  }
  0x7f   :  { %2045 = vmatpush3.bf16.msra.mxu0 %v2170_v46  ;;  %749 = vmatmul.mubr.bf16.vlgmr.msra.gmra.mrb[0].mxu1 %v151_v50  ;;  %v2226_v46 = vld [vmem:[#allocation8 + $0x8] sm:$0xff]  }
  0x80   :  { %2046 = vmatprep.subr.bf16.mxu0 %v2172_v51  ;;  %2067 = vmatpush3.bf16.msra.mxu1 %v2171_v49  ;;  %v2229_v49 = vld [vmem:[#allocation8 + $0x20] sm:$0xff]   ;;  %v2230_v50 = vld [vmem:[#allocation8 + $0x28] sm:$0xff]   ;;  %v2231_v51 = vld [vmem:[#allocation8 + $0x30] sm:$0xff]  }
  0x81   :  { %2068 = vmatprep.subr.bf16.mxu1 %v2173_v53  ;;  %788 = vmatprep.mubr.bf16.mxu0 %v154_v22  ;;  %v1841_v53 = vld [vmem:[%s2641_s2] ss:$0 sm:$0xff]  ;;  %v1109_v22 = vld [vmem:[#allocation10 + $0x40] sm:$0xff] }
  0x82   :  { %828 = vmatprep.mubr.bf16.mxu1 %v156_v25 }
  0x83   :  { %2047 = vmatpush3.bf16.msra.mxu0 %v2174_v54 }
  0x84   :  { %2048 = vmatprep.subr.bf16.mxu0 %v2176_v56  ;;  %2069 = vmatpush3.bf16.msra.mxu1 %v2175_v55 }
  0x85   :  { %2070 = vmatprep.subr.bf16.mxu1 %v2177_v57 }
  0x87   :  { %2049 = vmatpush3.bf16.msra.mxu0 %v2178_v58 }
  0x88   :  { %2050 = vmatprep.subr.bf16.mxu0 %v2180_v60  ;;  %2071 = vmatpush3.bf16.msra.mxu1 %v2179_v59 }
  0x89   :  { %2072 = vmatprep.subr.bf16.mxu1 %v2181_v61 }
  0x8b   :  { %2051 = vmatpush3.bf16.msra.mxu0 %v2182_v62 }
  0x8c   :  { %2052 = vmatprep.subr.bf16.mxu0 %v2184_v0  ;;  %2073 = vmatpush3.bf16.msra.mxu1 %v2183_v63 }
  0x8d   :  { %2074 = vmatprep.subr.bf16.mxu1 %v2185_v1 }
  0x8f   :  { %2053 = vmatpush3.bf16.msra.mxu0 %v2186_v2 }
  0x90   :  { %2054 = vmatprep.subr.bf16.mxu0 %v2188_v4  ;;  %2075 = vmatpush3.bf16.msra.mxu1 %v2187_v3 }
  0x91   :  { %2076 = vmatprep.subr.bf16.mxu1 %v2189_v5 }
  0x93   :  { %2055 = vmatpush3.bf16.msra.mxu0 %v2190_v6 }
  0x94   :  { %2056 = vmatprep.subr.bf16.mxu0 %v2192_v8  ;;  %2077 = vmatpush3.bf16.msra.mxu1 %v2191_v7 }
  0x95   :  { %2078 = vmatprep.subr.bf16.mxu1 %v2193_v9 }
  0x97   :  { %2057 = vmatpush3.bf16.msra.mxu0 %v2194_v10 }
  0x98   :  { %2058 = vmatprep.subr.bf16.mxu0 %v2196_v12  ;;  %2079 = vmatpush3.bf16.msra.mxu1 %v2195_v11 }
  0x99   :  { %2080 = vmatprep.subr.bf16.mxu1 %v2197_v13 }
  0x9b   :  { %2059 = vmatpush3.bf16.msra.mxu0 %v2198_v14 }
  0x9c   :  { %2081 = vmatpush3.bf16.msra.mxu1 %v2199_v16  ;;  %946 = vmatprep.subr.bf16.mxu0 %v2203_v27  ;;  %v1101_v16 = vld [vmem:[#allocation10] sm:$0xff]  ;;  %v1939_v27 = vcombine.low %v1109_v22, %v1113_v23 }
  0x9d   :  { %2097 = vmatprep.subr.bf16.mxu1 %v2442_v45  ;;  %v1931_v19 = vcombine.low %v1101_v16, %v1105_v17  ;;  %v1932_v20 = vcombine.high %v1101_v16, %v1105_v17 }
  0x9e   :  { %789 = vmatmul.mubr.bf16.vlgmr.msra.gmra.mrb[4].mxu0 %v153_v21  ;;  %v1106_v21 = vld [vmem:[#allocation10 + $0x28] sm:$0xff] }
  0x9f   :  { %829 = vmatmul.mubr.bf16.vlgmr.msra.gmra.mrb[4].mxu1 %v155_v24  ;;  %947 = vmatpush1.bf16.msra.mxu0 %v2201_v26  ;;  %v1933_v24 = vcombine.low %v2576_v18, %v1106_v21  ;;  %v1934_v25 = vcombine.high %v2576_v18, %v1106_v21  ;;  %v1940_v26 = vcombine.high %v1109_v22, %v1113_v23  ;;  %v1150_v18 = vld [vmem:[#allocation10 + $0x188] sm:$0xff]  ;;  %v1157_v23 = vld [vmem:[#allocation10 + $0x1c0] sm:$0xff] }
  0xa0   :  { %948 = vmatprep.subr.bf16.mxu0 %v2206_v28  ;;  %978 = vmatprep.mubr.bf16.mxu0 %v2441_v43  ;;  %v1117_v28 = vld [vmem:[#allocation10 + $0x80] sm:$0xff] }
  0xa1   :  { %2098 = vmatpush3.bf16.msra.mxu1 %v2225_v44  ;;  %2113 = vmatprep.mubr.msk.bf16.mxu1 %vm2443_vm0, %v2442_v45 }
  0xa2   :  { %2099 = vmatprep.subr.bf16.mxu1 %v2442_v45 }
  0xa3   :  { %949 = vmatpush1.bf16.msra.mxu0 %v2204_v29  ;;  %v1121_v29 = vld [vmem:[#allocation10 + $0xa0] sm:$0xff] }
  0xa4   :  { %950 = vmatprep.subr.bf16.mxu0 %v2209_v31  ;;  %v1948_v31 = vcombine.high %v1117_v28, %v1121_v29 }
  0xa5   :  { %2100 = vmatpush3.bf16.msra.mxu1 %v2226_v46  ;;  %v1149_v46 = vld [vmem:[#allocation10 + $0x180] sm:$0xff] }
  0xa6   :  { %2101 = vmatprep.subr.bf16.mxu1 %v2442_v45 }
  0xa7   :  { %951 = vmatpush1.bf16.msra.mxu0 %v2207_v32  ;;  %v1947_v32 = vcombine.low %v1117_v28, %v1121_v29 }
  0xa8   :  { %952 = vmatprep.subr.bf16.mxu0 %v2212_v33  ;;  %v1125_v33 = vld [vmem:[#allocation10 + $0xc0] sm:$0xff] }
  0xa9   :  { %2102 = vmatpush3.bf16.msra.mxu1 %v2227_v47  ;;  %v1153_v47 = vld [vmem:[#allocation10 + $0x1a0] sm:$0xff] }
  0xaa   :  { %2103 = vmatprep.subr.bf16.mxu1 %v2442_v45 }
  0xab   :  { %953 = vmatpush1.bf16.msra.mxu0 %v2210_v34  ;;  %v1129_v34 = vld [vmem:[#allocation10 + $0xe0] sm:$0xff] }
  0xac   :  { %954 = vmatprep.subr.bf16.mxu0 %v2215_v35  ;;  %v1956_v35 = vcombine.high %v1125_v33, %v1129_v34 }
  0xad   :  { %2104 = vmatpush3.bf16.msra.mxu1 %v2228_v48  ;;  %v1980_v48 = vcombine.high %v1149_v46, %v1153_v47 }
  0xae   :  { %2105 = vmatprep.subr.bf16.mxu1 %v2442_v45 }
  0xaf   :  { %955 = vmatpush1.bf16.msra.mxu0 %v2213_v36  ;;  %v1955_v36 = vcombine.low %v1125_v33, %v1129_v34  ;;  %v1107_v33 = vld [vmem:[#allocation10 + $0x30] sm:$0xff]  ;;  %v1104_v34 = vld [vmem:[#allocation10 + $0x18] sm:$0xff] }
  0xb0   :  { %956 = vmatprep.subr.bf16.mxu0 %v2218_v37  ;;  %v1133_v37 = vld [vmem:[#allocation10 + $0x100] sm:$0xff] }
  0xb1   :  { %2106 = vmatpush3.bf16.msra.mxu1 %v2229_v49  ;;  %v1979_v49 = vcombine.low %v1149_v46, %v1153_v47  ;;  %v1115_v47 = vld [vmem:[#allocation10 + $0x70] sm:$0xff] }
  0xb2   :  { %2107 = vmatprep.subr.bf16.mxu1 %v2442_v45 }
  0xb3   :  { %957 = vmatpush1.bf16.msra.mxu0 %v2216_v38  ;;  %v1137_v38 = vld [vmem:[#allocation10 + $0x120] sm:$0xff] }
  0xb4   :  { %958 = vmatprep.subr.bf16.mxu0 %v2221_v39  ;;  %v1964_v39 = vcombine.high %v1133_v37, %v1137_v38 }
  0xb5   :  { %2108 = vmatpush3.bf16.msra.mxu1 %v2230_v50  ;;  %v858_v50 = vsub.s32 0, %v2562_v30 }
  0xb6   :  { %2109 = vmatprep.subr.bf16.mxu1 %v2442_v45 }
  0xb7   :  { %959 = vmatpush1.bf16.msra.mxu0 %v2219_v40  ;;  %v1963_v40 = vcombine.low %v1133_v37, %v1137_v38  ;;  %v1108_v37 = vld [vmem:[#allocation10 + $0x38] sm:$0xff] }
  0xb8   :  { %960 = vmatprep.subr.bf16.mxu0 %v2224_v41  ;;  %v1141_v41 = vld [vmem:[#allocation10 + $0x140] sm:$0xff]  ;;  %v1937_v38 = vcombine.low %v1104_v34, %v1108_v37 }
  0xb9   :  { %2110 = vmatpush3.bf16.msra.mxu1 %v2231_v51  ;;  %v854_v51 = vld [vmem:[%s2643_s4] sm:$0x3] }
  0xba   :  { %2111 = vmatprep.subr.bf16.mxu1 %v2442_v45 }
  0xbb   :  { %961 = vmatpush1.bf16.msra.mxu0 %v2222_v42  ;;  %v1145_v42 = vld [vmem:[#allocation10 + $0x160] sm:$0xff] }
  0xbc   :  { %1527 = vmatprep.subr.bf16.mxu0 %v1932_v20  ;;  %v1972_v44 = vcombine.high %v1141_v41, %v1145_v42  ;;  %v1971_v45 = vcombine.low %v1141_v41, %v1145_v42 }
  0xbd   :  { %2112 = vmatpush3.bf16.msra.mxu1 %v2232_v15  ;;  %v1146_v15 = vld [vmem:[#allocation10 + $0x168] sm:$0xff] }
  0xbe   :  { %1568 = vmatprep.subr.bf16.mxu1 %v1934_v25  ;;  %v1158_v25 = vld [vmem:[#allocation10 + $0x1c8] sm:$0xff] }
 0x151   :  { %v2016_v52 = vpop.f32.mrb[0].mxu0 }
 0x152   :  { %v2017_v54 = vpop.f32.mrb[1].mxu0  ;;  %v2038_v55 = vpop.f32.mrb[0].mxu1 }
 0x153   :  { %v2018_v56 = vadd.f32 %v2017_v54, %v2016_v52  ;;  %v2019_v57 = vpop.f32.mrb[2].mxu0  ;;  %v2039_v58 = vpop.f32.mrb[1].mxu1  ;;  %v862_v52 = vsub.s32 1, %v2562_v30 }
 0x154   :  { %v2020_v59 = vpop.f32.mrb[3].mxu0  ;;  %v2040_v61 = vadd.f32 %v2039_v58, %v2038_v55  ;;  %v2041_v62 = vpop.f32.mrb[2].mxu1  ;;  %v1114_v57 = vld [vmem:[#allocation10 + $0x68] sm:$0xff] }
 0x155   :  { %v711_v60 = vadd.f32 %v2018_v56, %v1841_v53  ;;  %v2042_v63 = vpop.f32.mrb[3].mxu1  ;;  %v859_v53 = vrot.slane %v854_v51, %v858_v50  ;;  %v863_v54 = vrot.slane %v854_v51, %v862_v52  ;;  %v1110_v56 = vld [vmem:[#allocation10 + $0x48] sm:$0xff] }
 0x157   :  { %v751_v0 = vadd.f32 %v2040_v61, %v711_v60 }
 0x171   :  { %v2060_v1 = vpop.f32.mrb[4].mxu0 }
 0x172   :  { %v2061_v2 = vpop.f32.mrb[5].mxu0  ;;  %v2082_v3 = vpop.f32.mrb[4].mxu1 }
 0x173   :  { %v2062_v4 = vadd.f32 %v2061_v2, %v2060_v1  ;;  %v2063_v5 = vpop.f32.mrb[6].mxu0  ;;  %v2083_v6 = vpop.f32.mrb[5].mxu1  ;;  %v1118_v2 = vld [vmem:[#allocation10 + $0x88] sm:$0xff] }
 0x174   :  { %v2064_v7 = vpop.f32.mrb[7].mxu0  ;;  %v2084_v9 = vadd.f32 %v2083_v6, %v2082_v3  ;;  %v2085_v10 = vpop.f32.mrb[6].mxu1  ;;  %v1122_v3 = vld [vmem:[#allocation10 + $0xa8] sm:$0xff] }
 0x175   :  { %v791_v8 = vadd.f32 %v2062_v4, %v751_v0  ;;  %v2086_v11 = vpop.f32.mrb[7].mxu1  ;;  %v1942_v0 = vcombine.high %v1110_v56, %v1114_v57  ;;  %v1941_v4 = vcombine.low %v1110_v56, %v1114_v57  ;;  %v1950_v5 = vcombine.high %v1118_v2, %v1122_v3  ;;  %v1126_v6 = vld [vmem:[#allocation10 + $0xc8] sm:$0xff]  ;;  %v1119_v57 = vld [vmem:[#allocation10 + $0x90] sm:$0xff] }
 0x176   :  { %v1130_v7 = vld [vmem:[#allocation10 + $0xe8] sm:$0xff] }
 0x177   :  { %v831_v12 = vadd.f32 %v2084_v9, %v791_v8  ;;  %v1949_v8 = vcombine.low %v1118_v2, %v1122_v3  ;;  %v1958_v9 = vcombine.high %v1126_v6, %v1130_v7  ;;  %v1134_v10 = vld [vmem:[#allocation10 + $0x108] sm:$0xff]  ;;  %v1131_v2 = vld [vmem:[#allocation10 + $0xf0] sm:$0xff]  ;;  %v1128_v3 = vld [vmem:[#allocation10 + $0xd8] sm:$0xff] }
 0x178   :  { %v1138_v11 = vld [vmem:[#allocation10 + $0x128] sm:$0xff] }
 0x179   :  { %v836_v13 = vmax.f32 %v831_v12, 0.0  ;;  %v1957_v12 = vcombine.low %v1126_v6, %v1130_v7  ;;  %v1965_v16 = vcombine.low %v1134_v10, %v1138_v11 }
 0x17b   :  { %v837_v14 = vpack.c.bf16 %v836_v13, %v836_v13  ;;  %v1966_v13 = vcombine.high %v1134_v10, %v1138_v11  ;;  %v1139_v10 = vld [vmem:[#allocation10 + $0x130] sm:$0xff]  ;;  %v1136_v11 = vld [vmem:[#allocation10 + $0x118] sm:$0xff] }
 0x17d   :  { %979 = vmatmul.mubr.bf16.vlgmr.msra.gmra.mrb[8].mxu0 %v837_v14  ;;  %v1142_v14 = vld [vmem:[#allocation10 + $0x148] sm:$0xff] }
 0x17e   :  { %1559 = vmatprep.mubr.bf16.mxu0 %v2441_v43  ;;  %1528 = vmatpush1.bf16.msra.mxu0 %v1931_v19  ;;  %v1974_v17 = vcombine.high %v1142_v14, %v1146_v15  ;;  %v1154_v19 = vld [vmem:[#allocation10 + $0x1a8] sm:$0xff]  ;;  %v1973_v20 = vcombine.low %v1142_v14, %v1146_v15 }
 0x17f   :  { %1529 = vmatprep.subr.bf16.mxu0 %v1940_v26  ;;  %v1982_v21 = vcombine.high %v1150_v18, %v1154_v19  ;;  %v1981_v22 = vcombine.low %v1150_v18, %v1154_v19  ;;  %v1144_v18 = vld [vmem:[#allocation10 + $0x158] sm:$0xff] }
 0x180   :  { %v1148_v19 = vld [vmem:[#allocation10 + $0x178] sm:$0xff] }
 0x182   :  { %1530 = vmatpush1.bf16.msra.mxu0 %v1939_v27  ;;  %v1162_v27 = vld [vmem:[#allocation10 + $0x1e8] sm:$0xff] }
 0x183   :  { %1531 = vmatprep.subr.bf16.mxu0 %v1948_v31  ;;  %v1989_v29 = vcombine.low %v1158_v25, %v1162_v27  ;;  %v1990_v31 = vcombine.high %v1158_v25, %v1162_v27  ;;  %v1155_v25 = vld [vmem:[#allocation10 + $0x1b0] sm:$0xff]  ;;  %v1156_v27 = vld [vmem:[#allocation10 + $0x1b8] sm:$0xff] }
 0x186   :  { %1532 = vmatpush1.bf16.msra.mxu0 %v1947_v32  ;;  %v1103_v32 = vld [vmem:[#allocation10 + $0x10] sm:$0xff] }
 0x187   :  { %1533 = vmatprep.subr.bf16.mxu0 %v1956_v35  ;;  %v1935_v35 = vcombine.low %v1103_v32, %v1107_v33 }
 0x18a   :  { %1534 = vmatpush1.bf16.msra.mxu0 %v1955_v36  ;;  %v1936_v36 = vcombine.high %v1103_v32, %v1107_v33  ;;  %v1159_v33 = vld [vmem:[#allocation10 + $0x1d0] sm:$0xff] }
 0x18b   :  { %1535 = vmatprep.subr.bf16.mxu0 %v1964_v39  ;;  %v1938_v39 = vcombine.high %v1104_v34, %v1108_v37  ;;  %v1163_v34 = vld [vmem:[#allocation10 + $0x1f0] sm:$0xff] }
 0x18e   :  { %1536 = vmatpush1.bf16.msra.mxu0 %v1963_v40  ;;  %v1922_v40 = vld [vmem:[%s2645_s6] ss:$0 sm:$0xff]  ;;  %s2444_s6 = smov [#allocation12]  }
 0x18f   :  { %1537 = vmatprep.subr.bf16.mxu0 %v1972_v44  ;;  %s1826_s18 = sshll.u32 %s2444_s6, 4  ;;  %s1827_s18 = int_to_ptr.vmem [resolvable:$true] %s1826_s18 }
 0x190   :  { %s2375_s1 = scalar_lea.vmem %s1827_s18, 64  ;;  %p2380_p13 = scmp.lt.s32.totalorder %s1827_s18, %s1827_s18 }
 0x191   :  { %p2376_p12 = scmp.ne.s32.totalorder %s1827_s18, %s2375_s1  ;;  %p2381_p0 = scmp.lt.s32.totalorder %s2375_s1, %s2375_s1 }
 0x192   :  { %1538 = vmatpush1.bf16.msra.mxu0 %v1971_v45  ;;  %v1111_v45 = vld [vmem:[#allocation10 + $0x50] sm:$0xff] }
 0x193   :  { %1539 = vmatprep.subr.bf16.mxu0 %v1980_v48  ;;  %v1112_v48 = vld [vmem:[#allocation10 + $0x58] sm:$0xff]  ;;  %p2382_p1 = por %p2381_p0, %p2380_p13 }
 0x195   :  { %p2383_p2 = pnand %p2382_p1, %p2376_p12 }
 0x196   :  { %1540 = vmatpush1.bf16.msra.mxu0 %v1979_v49  ;;  %v1116_v49 = vld [vmem:[#allocation10 + $0x78] sm:$0xff] }
 0x197   :  { %v1946_v56 = vcombine.high %v1112_v48, %v1116_v49 }
 0x250   :  { %v980_v55 = vpop.f32.mrb[8].mxu0 }
 0x251   :  { %v981_v58 = vadd.f32 %v980_v55, %v859_v53  ;;  %v982_v59 = vpop.f32.mrb[9].mxu0  ;;  %v1944_v55 = vcombine.high %v1111_v45, %v1115_v47 }
 0x252   :  { %v983_v60 = vadd.f32 %v982_v59, %v863_v54  ;;  %v984_v61 = vpop.f32.mrb[10].mxu0  ;;  %v1120_v59 = vld [vmem:[#allocation10 + $0x98] sm:$0xff] }
 0x253   :  { %v987_v62 = vpack.c.bf16 %v981_v58, %v981_v58  ;;  %v985_v63 = vpop.f32.mrb[11].mxu0  ;;  %v1943_v61 = vcombine.low %v1111_v45, %v1115_v47 }
 0x254   :  { %v1800_v1 = vcombine.low %v981_v58, %v983_v60  ;;  %v1123_v58 = vld [vmem:[#allocation10 + $0xb0] sm:$0xff]  ;;  %v1124_v60 = vld [vmem:[#allocation10 + $0xb8] sm:$0xff] }
 0x255   :  { %2114 = vmatmul.mubr.bf16.vlgmr.msra.gmra.mrb[8].mxu1 %v987_v62  ;;  %v1945_v62 = vcombine.low %v1112_v48, %v1116_v49  ;;  %v1952_v63 = vcombine.high %v1119_v57, %v1123_v58  ;;  %v1953_v6 = vcombine.low %v1120_v59, %v1124_v60 }
 0x256   :  { %1999 = vst.sshfl [vmem:[#allocation12] sm:$0x33 pattern:$0x76325410] %v1800_v1  ;;  %1569 = vmatpush1.bf16.msra.mxu1 %v1933_v24  ;;  %1600 = vmatprep.mubr.bf16.mxu1 %v2441_v43  ;;  %v1161_v24 = vld [vmem:[#allocation10 + $0x1e0] sm:$0xff]  ;;  %v1127_v1 = vld [vmem:[#allocation10 + $0xd0] sm:$0xff] }
 0x257   :  { %1570 = vmatprep.subr.bf16.mxu1 %v1942_v0  ;;  %v1988_v26 = vcombine.high %v1157_v23, %v1161_v24  ;;  %v1987_v28 = vcombine.low %v1157_v23, %v1161_v24  ;;  %v1954_v0 = vcombine.high %v1120_v59, %v1124_v60  ;;  %v1960_v7 = vcombine.high %v1127_v1, %v1131_v2  ;;  %v1151_v24 = vld [vmem:[#allocation10 + $0x190] sm:$0xff] }
 0x258   :  { %v1978_v23 = vcombine.high %v1144_v18, %v1148_v19  ;;  %v1983_v37 = vcombine.low %v1151_v24, %v1155_v25 }
 0x259   :  { %1541 = vmatprep.subr.bf16.mxu0 %v1988_v26  ;;  %v1152_v26 = vld [vmem:[#allocation10 + $0x198] sm:$0xff] }
 0x25a   :  { %1571 = vmatpush1.bf16.msra.mxu1 %v1941_v4  ;;  %1542 = vmatpush1.bf16.msra.mxu0 %v1987_v28  ;;  %v1132_v4 = vld [vmem:[#allocation10 + $0xf8] sm:$0xff]  ;;  %v1986_v32 = vcombine.high %v1152_v26, %v1156_v27 }
 0x25b   :  { %1572 = vmatprep.subr.bf16.mxu1 %v1950_v5  ;;  %1609 = vmatprep.subr.bf16.mxu0 %v1936_v36  ;;  %v1951_v5 = vcombine.low %v1119_v57, %v1123_v58  ;;  %v1961_v14 = vcombine.low %v1128_v3, %v1132_v4  ;;  %v1164_v36 = vld [vmem:[#allocation10 + $0x1f8] sm:$0xff] }
 0x25e   :  { %1573 = vmatpush1.bf16.msra.mxu1 %v1949_v8  ;;  %v1962_v8 = vcombine.high %v1128_v3, %v1132_v4 }
 0x25f   :  { %1574 = vmatprep.subr.bf16.mxu1 %v1958_v9  ;;  %v1135_v9 = vld [vmem:[#allocation10 + $0x110] sm:$0xff] }
 0x260   :  { %v1968_v15 = vcombine.high %v1135_v9, %v1139_v10 }
 0x262   :  { %1575 = vmatpush1.bf16.msra.mxu1 %v1957_v12  ;;  %v1140_v12 = vld [vmem:[#allocation10 + $0x138] sm:$0xff] }
 0x263   :  { %1576 = vmatprep.subr.bf16.mxu1 %v1966_v13  ;;  %v1959_v13 = vcombine.low %v1127_v1, %v1131_v2 }
 0x266   :  { %1577 = vmatpush1.bf16.msra.mxu1 %v1965_v16  ;;  %v1143_v16 = vld [vmem:[#allocation10 + $0x150] sm:$0xff] }
 0x267   :  { %1578 = vmatprep.subr.bf16.mxu1 %v1974_v17  ;;  %v1147_v17 = vld [vmem:[#allocation10 + $0x170] sm:$0xff] }
 0x268   :  { %v1975_v28 = vcombine.low %v1143_v16, %v1147_v17 }
 0x26a   :  { %1579 = vmatpush1.bf16.msra.mxu1 %v1973_v20  ;;  %v1967_v20 = vcombine.low %v1135_v9, %v1139_v10 }
 0x26b   :  { %1580 = vmatprep.subr.bf16.mxu1 %v1982_v21  ;;  %v1969_v21 = vcombine.low %v1136_v11, %v1140_v12 }
 0x26e   :  { %1581 = vmatpush1.bf16.msra.mxu1 %v1981_v22  ;;  %v1976_v22 = vcombine.high %v1143_v16, %v1147_v17 }
 0x26f   :  { %1582 = vmatprep.subr.bf16.mxu1 %v1990_v31  ;;  %v1984_v31 = vcombine.high %v1151_v24, %v1155_v25 }
 0x272   :  { %1583 = vmatpush1.bf16.msra.mxu1 %v1989_v29  ;;  %v1977_v29 = vcombine.low %v1144_v18, %v1148_v19 }
 0x273   :  { %1650 = vmatprep.subr.bf16.mxu1 %v1938_v39  ;;  %v1992_v39 = vcombine.high %v1159_v33, %v1163_v34 }
 0x328   :  { %v1093_v41 = vpop.f32.mrb[8].mxu1 }
 0x329   :  { %v1094_v42 = vadd.f32 %v1922_v40, %v1093_v41  ;;  %v2115_v44 = vpop.f32.mrb[9].mxu1  ;;  %v1991_v41 = vcombine.low %v1159_v33, %v1163_v34 }
 0x32a   :  { %v1096_v46 = vpop.f32.mrb[10].mxu1 }
 0x32b   :  { %v1099_v51 = vmax.f32 %v1094_v42, 0.0  ;;  %v2116_v53 = vpop.f32.mrb[11].mxu1 }
 0x32d   :  { %v2593_v54 = vpack.c.bf16 %v1099_v51, %v1099_v51 }
 0x32f   :  { %1560 = vmatmul.mubr.bf16.vlgmr.msra.gmra.mrb[12].mxu0 %v2593_v54  ;;  %1601 = vmatmul.mubr.bf16.vlgmr.msra.gmra.mrb[12].mxu1 %v2593_v54 }
 0x330   :  { %1610 = vmatpush1.bf16.msra.mxu0 %v1935_v35  ;;  %1651 = vmatpush1.bf16.msra.mxu1 %v1937_v38  ;;  %v1160_v35 = vld [vmem:[#allocation10 + $0x1d8] sm:$0xff]  ;;  %v1985_v38 = vcombine.low %v1152_v26, %v1156_v27 }
 0x331   :  { %1611 = vmatprep.subr.bf16.mxu0 %v1944_v55  ;;  %1652 = vmatprep.subr.bf16.mxu1 %v1946_v56  ;;  %v1994_v40 = vcombine.high %v1160_v35, %v1164_v36  ;;  %v1993_v42 = vcombine.low %v1160_v35, %v1164_v36 }
 0x332   :  { %1641 = vmatprep.mubr.bf16.mxu0 %v2441_v43  ;;  %1682 = vmatprep.mubr.bf16.mxu1 %v2441_v43  ;;  %v1970_v43 = vcombine.high %v1136_v11, %v1140_v12 }
 0x334   :  { %1612 = vmatpush1.bf16.msra.mxu0 %v1943_v61  ;;  %1653 = vmatpush1.bf16.msra.mxu1 %v1945_v62 }
 0x335   :  { %1613 = vmatprep.subr.bf16.mxu0 %v1952_v63  ;;  %1654 = vmatprep.subr.bf16.mxu1 %v1954_v0 }
 0x338   :  { %1614 = vmatpush1.bf16.msra.mxu0 %v1951_v5  ;;  %1655 = vmatpush1.bf16.msra.mxu1 %v1953_v6 }
 0x339   :  { %1615 = vmatprep.subr.bf16.mxu0 %v1960_v7  ;;  %1656 = vmatprep.subr.bf16.mxu1 %v1962_v8 }
 0x33c   :  { %1616 = vmatpush1.bf16.msra.mxu0 %v1959_v13  ;;  %1657 = vmatpush1.bf16.msra.mxu1 %v1961_v14 }
 0x33d   :  { %1617 = vmatprep.subr.bf16.mxu0 %v1968_v15  ;;  %1658 = vmatprep.subr.bf16.mxu1 %v1970_v43 }
 0x340   :  { %1618 = vmatpush1.bf16.msra.mxu0 %v1967_v20  ;;  %1659 = vmatpush1.bf16.msra.mxu1 %v1969_v21 }
 0x341   :  { %1619 = vmatprep.subr.bf16.mxu0 %v1976_v22  ;;  %1660 = vmatprep.subr.bf16.mxu1 %v1978_v23 }
 0x344   :  { %1620 = vmatpush1.bf16.msra.mxu0 %v1975_v28  ;;  %1661 = vmatpush1.bf16.msra.mxu1 %v1977_v29 }
 0x345   :  { %1621 = vmatprep.subr.bf16.mxu0 %v1984_v31  ;;  %1662 = vmatprep.subr.bf16.mxu1 %v1986_v32 }
 0x348   :  { %1622 = vmatpush1.bf16.msra.mxu0 %v1983_v37  ;;  %1663 = vmatpush1.bf16.msra.mxu1 %v1985_v38 }
 0x349   :  { %1623 = vmatprep.subr.bf16.mxu0 %v1992_v39  ;;  %1664 = vmatprep.subr.bf16.mxu1 %v1994_v40 }
 0x34c   :  { %1624 = vmatpush1.bf16.msra.mxu0 %v1991_v41  ;;  %1665 = vmatpush1.bf16.msra.mxu1 %v1993_v42 }
 0x34f   :  { %1642 = vmatmul.mubr.bf16.vlgmr.msra.gmra.mrb[16].mxu0 %v2593_v54  ;;  %1683 = vmatmul.mubr.bf16.vlgmr.msra.gmra.mrb[16].mxu1 %v2593_v54 }
 0x350   :  { %2386 = shalt.err (!%p2383_p2)
}
 0x351   :  { %s2387_s30 = scalar_lea.hbm %s2649_s10, 64 }
 0x352   :  { %p2388_p3 = scmp.ne.s32.totalorder %s2649_s10, %s2387_s30  ;;  %p2391_p4 = scmp.lt.u32.totalorder %s2387_s30, %s2649_s10 }
 0x354   :  { %p2393_p5 = pnand %p2391_p4, %p2388_p3 }
 0x356   :  { %2396 = shalt.err (!%p2393_p5)
}
 0x357   :  { %1829 = dma.vmem_to_hbm [thread:$0]  %s1827_s18, 64, %s2649_s10, [#allocation13]   ;;  %v1177_v44 = vsub.s32 2, %v2562_v30  ;;  %v1165_v45 = vld [vmem:[%s2647_s8] sm:$0xff]  ;;  %v1181_v46 = vsub.s32 3, %v2562_v30  ;;  %v1185_v16 = vsub.s32 4, %v2562_v30 }
 0x358   :  { %v1170_v47 = vrot.slane %v1165_v45, %v858_v50  ;;  %v1174_v49 = vrot.slane %v1165_v45, %v862_v52  ;;  %v2445_v15 = vmov 1966171168   ;;  %v1193_v17 = vsub.s32 6, %v2562_v30  ;;  %s2446_s8 = smov [#allocation11]  }
 0x359   :  { %v1178_v48 = vrot.slane %v1165_v45, %v1177_v44  ;;  %v1182_v51 = vrot.slane %v1165_v45, %v1181_v46  ;;  %v1752_v43 = vunpack.c.l.s4 %v2445_v15  ;;  %v1189_v18 = vsub.s32 5, %v2562_v30  ;;  %s1816_s10 = sshll.u32 %s2446_s8, 4  ;;  %s1817_s10 = int_to_ptr.vmem [resolvable:$true] %s1816_s10 }
 0x35a   :  { %v1197_v19 = vsub.s32 7, %v2562_v30  ;;  %v1186_v21 = vrot.slane %v1165_v45, %v1185_v16  ;;  %v1194_v22 = vrot.slane %v1165_v45, %v1193_v17  ;;  %s2397_s11 = scalar_lea.vmem %s1817_s10, 128  ;;  %p2402_p7 = scmp.lt.s32.totalorder %s1817_s10, %s1817_s10 }
 0x35b   :  { %v1753_v20 = vunpack.c.0.s8 %v1752_v43  ;;  %v1190_v24 = vrot.slane %v1165_v45, %v1189_v18  ;;  %p2398_p6 = scmp.ne.s32.totalorder %s1817_s10, %s2397_s11  ;;  %p2403_p8 = scmp.lt.s32.totalorder %s2397_s11, %s2397_s11 }
 0x35c   :  { %v1198_v25 = vrot.slane %v1165_v45, %v1197_v19 }
 0x35d   :  { %v1756_v27 = vsub.s32 %v1753_v20, %v2562_v30  ;;  %p2404_p9 = por %p2403_p8, %p2402_p7 }
 0x35f   :  { %p2405_p10 = pnand %p2404_p9, %p2398_p6 }
 0x402   :  { %v1561_v53 = vpop.f32.mrb[12].mxu0  ;;  %v1602_v54 = vpop.f32.mrb[12].mxu1 }
 0x403   :  { %v1562_v55 = vadd.f32 %v1561_v53, %v1170_v47  ;;  %v1603_v56 = vadd.f32 %v1602_v54, %v1178_v48  ;;  %v1563_v57 = vpop.f32.mrb[13].mxu0  ;;  %v1604_v58 = vpop.f32.mrb[13].mxu1 }
 0x404   :  { %v1564_v59 = vadd.f32 %v1563_v57, %v1174_v49  ;;  %v1605_v60 = vadd.f32 %v1604_v58, %v1182_v51  ;;  %v1565_v61 = vpop.f32.mrb[14].mxu0  ;;  %v1606_v62 = vpop.f32.mrb[14].mxu1 }
 0x405   :  { %v1691_v63 = vsub.f32 0.0, %v1562_v55  ;;  %v1693_v0 = vsub.f32 0.0, %v1603_v56  ;;  %v1566_v1 = vpop.f32.mrb[15].mxu0  ;;  %v1607_v2 = vpop.f32.mrb[15].mxu1 }
 0x406   :  { %v1692_v50 = vsub.f32 0.0, %v1564_v59  ;;  %v1694_v3 = vsub.f32 0.0, %v1605_v60 }
 0x407   :  { %v1699_v4 = vmul.f32 1.442695, %v1691_v63  ;;  %v1703_v5 = vmul.f32 1.442695, %v1693_v0 }
 0x408   :  { %v1701_v52 = vmul.f32 1.442695, %v1692_v50  ;;  %v1705_v6 = vmul.f32 1.442695, %v1694_v3 }
 0x409   :  { %2233 = vpow2.f32 %v1699_v4 }
 0x40a   :  { %2235 = vpow2.f32 %v1703_v5 }
 0x40b   :  { %2237 = vpow2.f32 %v1701_v52 }
 0x40c   :  { %2239 = vpow2.f32 %v1705_v6 }
 0x413   :  { %v2234_v7 = vpop.eup %2233 }
 0x414   :  { %v2236_v8 = vpop.eup %2235  ;;  %v1715_v9 = vadd.f32 1.0, %v2234_v7 }
 0x415   :  { %v2238_v10 = vpop.eup %2237  ;;  %v1717_v11 = vadd.f32 1.0, %v2236_v8 }
 0x416   :  { %v2240_v12 = vpop.eup %2239  ;;  %2241 = vrcp.f32 %v1715_v9  ;;  %v1716_v13 = vadd.f32 1.0, %v2238_v10 }
 0x417   :  { %2243 = vrcp.f32 %v1717_v11  ;;  %v1718_v14 = vadd.f32 1.0, %v2240_v12 }
 0x418   :  { %2245 = vrcp.f32 %v1716_v13 }
 0x419   :  { %2247 = vrcp.f32 %v1718_v14 }
 0x420   :  { %v2242_v23 = vpop.eup %2241 }
 0x421   :  { %v2244_v26 = vpop.eup %2243 }
 0x422   :  { %v2246_v28 = vpop.eup %2245  ;;  %v1643_v29 = vpop.f32.mrb[16].mxu0 }
 0x423   :  { %v1684_v31 = vpop.f32.mrb[16].mxu1  ;;  %v2248_v32 = vpop.eup %2247  ;;  %v1644_v33 = vadd.f32 %v1643_v29, %v1186_v21  ;;  %v1995_v37 = vpack.c.bf16 %v2246_v28, %v2242_v23 }
 0x424   :  { %v1685_v34 = vadd.f32 %v1684_v31, %v1194_v22  ;;  %v1645_v35 = vpop.f32.mrb[17].mxu0  ;;  %v1686_v36 = vpop.f32.mrb[17].mxu1  ;;  %v1996_v42 = vpack.c.bf16 %v2248_v32, %v2244_v26 }
 0x425   :  { %v1646_v38 = vadd.f32 %v1645_v35, %v1190_v24  ;;  %v1687_v39 = vadd.f32 %v1686_v36, %v1198_v25  ;;  %v1647_v40 = vpop.f32.mrb[18].mxu0  ;;  %v1688_v41 = vpop.f32.mrb[18].mxu1  ;;  %v1695_v44 = vsub.f32 0.0, %v1644_v33  ;;  %v1757_v48 = vrot.slane %v1995_v37, %v1756_v27 }
 0x426   :  { %v1697_v46 = vsub.f32 0.0, %v1685_v34  ;;  %v1648_v45 = vpop.f32.mrb[19].mxu0  ;;  %v1689_v47 = vpop.f32.mrb[19].mxu1  ;;  %v1764_v51 = vrot.slane %v1996_v42, %v1756_v27 }
 0x427   :  { %v1696_v30 = vsub.f32 0.0, %v1646_v38  ;;  %v1698_v49 = vsub.f32 0.0, %v1687_v39  ;;  %v1707_v53 = vmul.f32 1.442695, %v1695_v44 }
 0x428   :  { %v1711_v54 = vmul.f32 1.442695, %v1697_v46  ;;  %v1779_v57 = vcombine.low %v1757_v48, %v1764_v51 }
 0x429   :  { %v1709_v55 = vmul.f32 1.442695, %v1696_v30  ;;  %v1713_v56 = vmul.f32 1.442695, %v1698_v49  ;;  %2249 = vpow2.f32 %v1707_v53 }
 0x42a   :  { %2251 = vpow2.f32 %v1711_v54  ;;  %v1787_v9 = vrot.slane %v1779_v57, %v1756_v27 }
 0x42b   :  { %2253 = vpow2.f32 %v1709_v55 }
 0x42c   :  { %2255 = vpow2.f32 %v1713_v56 }
 0x433   :  { %v2250_v58 = vpop.eup %2249 }
 0x434   :  { %v2252_v59 = vpop.eup %2251  ;;  %v1719_v60 = vadd.f32 1.0, %v2250_v58 }
 0x435   :  { %v2254_v61 = vpop.eup %2253  ;;  %v1721_v62 = vadd.f32 1.0, %v2252_v59 }
 0x436   :  { %v2256_v63 = vpop.eup %2255  ;;  %2257 = vrcp.f32 %v1719_v60  ;;  %v1720_v0 = vadd.f32 1.0, %v2254_v61 }
 0x437   :  { %2259 = vrcp.f32 %v1721_v62  ;;  %v1722_v1 = vadd.f32 1.0, %v2256_v63 }
 0x438   :  { %2261 = vrcp.f32 %v1720_v0 }
 0x439   :  { %2263 = vrcp.f32 %v1722_v1 }
 0x440   :  { %v2258_v2 = vpop.eup %2257 }
 0x441   :  { %v2260_v50 = vpop.eup %2259 }
 0x442   :  { %v2262_v3 = vpop.eup %2261 }
 0x443   :  { %v2264_v4 = vpop.eup %2263  ;;  %v1997_v5 = vpack.c.bf16 %v2262_v3, %v2258_v2 }
 0x444   :  { %v1998_v52 = vpack.c.bf16 %v2264_v4, %v2260_v50 }
 0x445   :  { %v1771_v6 = vrot.slane %v1997_v5, %v1756_v27 }
 0x446   :  { %v1778_v7 = vrot.slane %v1998_v52, %v1756_v27 }
 0x448   :  { %v1780_v8 = vcombine.low %v1771_v6, %v1778_v7 }
 0x44a   :  { %v1794_v10 = vrot.slane %v1780_v8, %v1756_v27 }
 0x44c   :  { %v1795_v11 = vcombine.low %v1787_v9, %v1794_v10 }
 0x44e   :  { %1797 = vst [vmem:[#allocation11] sm:$0xff] %v1795_v11 }
 0x44f   :  { %2408 = shalt.err (!%p2405_p10)
}
 0x450   :  { %s2409_s24 = scalar_lea.hbm %s2648_s9, 128 }
 0x451   :  { %p2410_p11 = scmp.ne.s32.totalorder %s2648_s9, %s2409_s24  ;;  %p2413_p12 = scmp.lt.u32.totalorder %s2409_s24, %s2648_s9 }
 0x453   :  { %p2415_p13 = pnand %p2413_p12, %p2410_p11 }
 0x455   :  { %2418 = shalt.err (!%p2415_p13)
}
 0x456   :  { %1819 = dma.vmem_to_hbm [thread:$0]  %s1817_s10, 128, %s2648_s9, [#allocation4]  }
 0x457   :  { %2425 = dma.done.wait [#allocation4], 128  }
 0x458   :  { %2426 = vsyncadd [#allocation4], 4294967168 }
 0x459   :  { %2427 = dma.done.wait [#allocation13], 64  }
 0x45a   :  { %2428 = vsyncadd [#allocation13], 4294967232 }
 0x45b   :  { %1836 = vsyncpa [#allocation3], 1 }
 0x45c   :  { %1837 = vsyncpa [#allocation6], 1 }
 0x45d   :  { %1838 = vsyncpa [#allocation9], 1 }
 0x45e   :  { %1839 = vsyncpa [#allocation4], 1 }
 0x45f   :  { %1840 = vsyncpa [#allocation13], 1 }

</bundles_post_ra>
